<compile_context>
chip_gen: v7x
topology: tpu7x:2x2x1
jax: 0.10.0
libtpu: 0.0.40
codegen_flags: <defaults>
</compile_context>

<pallas_src>
import functools

import jax
import jax.numpy as jnp
from jax import lax
from jax.experimental import pallas as pl
from jax.experimental.pallas import tpu as pltpu

LANE = 128
SUBLANE = 8


# ----------------------------- Pallas kernels -----------------------------

def _neighbor_aggregate(idx_ref, msg_ref, agg_ref, n_rows, max_nb):
    """agg[i] = sum_k(msg[idx[i,k]]) * max_k(msg[idx[i,k]])  (index-driven gather).

    idx_ref: SMEM int32 ref of shape (n_rows * max_nb,) (flattened neighbor table).
    msg_ref / agg_ref: VMEM refs.  Per destination row: max_nb dynamic single-row
    loads, incremental sum & max accumulation, one single-row store.
    """
    def row_body(i, carry):
        j0 = idx_ref[i * max_nb]
        first = msg_ref[pl.ds(j0, 1), :]
        s = first
        m = first
        for k in range(1, max_nb):                 # static, tiny unroll
            j = idx_ref[i * max_nb + k]
            row = msg_ref[pl.ds(j, 1), :]
            s = s + row
            m = jnp.maximum(m, row)
        agg_ref[pl.ds(i, 1), :] = s * m
        return carry

    lax.fori_loop(0, n_rows, row_body, 0)


def _atom_encoder_kernel(a2a_ref,                         # SMEM int32 (n_atoms*max_nb,)
                         f_in_ref, f_atoms_ref,           # VMEM inputs
                         wi_ref, bi_ref, wh_ref, bh_ref,
                         woa_ref, wom_ref, bo_ref,
                         o_ref,                            # VMEM output
                         inp_ref, msg_ref, agg_ref,        # VMEM scratch
                         *, depth, max_nb, n_atoms):
    inp = jnp.maximum(
        jnp.dot(f_in_ref[...], wi_ref[...], preferred_element_type=jnp.float32)
        + bi_ref[...], 0.0)
    inp_ref[...] = inp
    msg_ref[...] = inp
    agg_ref[...] = jnp.zeros_like(agg_ref)     # padded rows stay 0 forever

    for d in range(depth - 1):                 # static depth unroll, all resident
        _neighbor_aggregate(a2a_ref, msg_ref, agg_ref, n_atoms, max_nb)
        upd = jnp.dot(agg_ref[...], wh_ref[d],
                      preferred_element_type=jnp.float32) + bh_ref[d]
        msg_ref[...] = jnp.maximum(inp_ref[...] + upd, 0.0)

    _neighbor_aggregate(a2a_ref, msg_ref, agg_ref, n_atoms, max_nb)
    out = (jnp.dot(f_atoms_ref[...], woa_ref[...], preferred_element_type=jnp.float32)
           + jnp.dot(agg_ref[...], wom_ref[...], preferred_element_type=jnp.float32)
           + bo_ref[...])
    o_ref[...] = jnp.maximum(out, 0.0).astype(o_ref.dtype)


def _bond_encoder_kernel(a2b_ref, b2a_ref, b2revb_ref,     # SMEM int32
                         f_in_ref, f_atoms_ref,            # VMEM inputs
                         wi_ref, bi_ref, wh_ref, bh_ref,
                         woa_ref, wom_ref, bo_ref,
                         o_ref,                             # VMEM output
                         inp_ref, msg_ref, agg_ref, min_ref,  # VMEM scratch
                         *, depth, max_nb, n_atoms, n_bonds):
    inp = jnp.maximum(
        jnp.dot(f_in_ref[...], wi_ref[...], preferred_element_type=jnp.float32)
        + bi_ref[...], 0.0)
    inp_ref[...] = inp
    msg_ref[...] = inp
    agg_ref[...] = jnp.zeros_like(agg_ref)
    min_ref[...] = jnp.zeros_like(min_ref)

    def bond_update():
        # m_in[b] = agg[b2a[b]] - msg[b2revb[b]]  (index-driven per-bond rows)
        # TODO(synk): real chemprop b2revb is an even/odd pair swap; when that
        # structure is guaranteed, replace the msg[b2revb] gather with a cheap
        # sublane pair-swap (XLU) instead of per-row dynamic loads.
        def row_body(b, carry):
            ia = b2a_ref[b]
            ir = b2revb_ref[b]
            min_ref[pl.ds(b, 1), :] = (agg_ref[pl.ds(ia, 1), :]
                                       - msg_ref[pl.ds(ir, 1), :])
            return carry

        lax.fori_loop(0, n_bonds, row_body, 0)

    for d in range(depth - 1):
        _neighbor_aggregate(a2b_ref, msg_ref, agg_ref, n_atoms, max_nb)
        bond_update()
        upd = jnp.dot(min_ref[...], wh_ref[d],
                      preferred_element_type=jnp.float32) + bh_ref[d]
        msg_ref[...] = jnp.maximum(inp_ref[...] + upd, 0.0)

    _neighbor_aggregate(a2b_ref, msg_ref, agg_ref, n_atoms, max_nb)
    out = (jnp.dot(f_atoms_ref[...], woa_ref[...], preferred_element_type=jnp.float32)
           + jnp.dot(agg_ref[...], wom_ref[...], preferred_element_type=jnp.float32)
           + bo_ref[...])
    o_ref[...] = jnp.maximum(out, 0.0).astype(o_ref.dtype)


# ------------------------------- wrappers ---------------------------------

def _ceil_to(x, m):
    return (x + m - 1) // m * m


def _pad2(x, rows, cols):
    return jnp.pad(x, ((0, rows - x.shape[0]), (0, cols - x.shape[1])))


def _vmem_limit_bytes():
    """Generation-aware VMEM limit: ~3/4 of physical, capped at 100 MiB."""
    default_cap = 64 * 1024 * 1024
    try:
        cap = int(getattr(pltpu.get_tpu_info(), "vmem_capacity_bytes", default_cap))
    except Exception:
        cap = default_cap
    return int(min(max(cap * 3 // 4, 32 * 1024 * 1024), 100 * 1024 * 1024))


def readout(atom_hiddens, a_scope):
    """Vectorized pad_sequence-style readout (single gather, no per-molecule loop)."""
    n_rows, hidden = atom_hiddens.shape
    starts = jnp.asarray([s for s, _ in a_scope], dtype=jnp.int32)
    sizes = jnp.asarray([sz for _, sz in a_scope], dtype=jnp.int32)
    max_size = max(max(int(sz) for _, sz in a_scope), 1)
    pos = jnp.arange(max_size, dtype=jnp.int32)
    mask = (pos[None, :] < sizes[:, None]).astype(jnp.float32)
    idx = jnp.clip(starts[:, None] + pos[None, :], 0, n_rows - 1)
    vecs = jnp.take(atom_hiddens, idx.reshape(-1), axis=0)
    vecs = vecs.reshape(len(a_scope), max_size, hidden) * mask[..., None]
    return vecs, mask


def mpn_encoder_forward(params, *, f_input, f_atoms, a2x, a_scope,
                        atom_messages, depth, b2a=None, b2revb=None):
    """One fused MPNEncoder forward (dropout = identity, activation = ReLU)."""
    hidden = params["W_i"][0].shape[1]
    atom_fdim = f_atoms.shape[1]
    in_fdim = f_input.shape[1]
    n_atoms = f_atoms.shape[0]
    n_src = f_input.shape[0]                 # atoms (atom enc) / bonds (bond enc)
    max_nb = a2x.shape[1]

    # lane/sublane-aligned padded sizes (padding is exact: zero rows/cols)
    n_atoms_p = _ceil_to(n_atoms, SUBLANE)
    n_src_p = _ceil_to(n_src, SUBLANE)
    h_p = _ceil_to(hidden, LANE)
    afd_p = _ceil_to(atom_fdim, LANE)
    ifd_p = _ceil_to(in_fdim, LANE)

    f_in_p = _pad2(f_input, n_src_p, ifd_p)
    f_atoms_p = _pad2(f_atoms, n_atoms_p, afd_p)

    Wi, bi = params["W_i"]
    wi_p = _pad2(Wi, ifd_p, h_p)
    bi_p = _pad2(bi, 1, h_p)
    if depth > 1:
        wh_p = jnp.stack([_pad2(params[f"W_h_{d}"][0], h_p, h_p)
                          for d in range(depth - 1)])
        bh_p = jnp.stack([_pad2(params[f"W_h_{d}"][1], 1, h_p)
                          for d in range(depth - 1)])
    else:
        wh_p = jnp.zeros((1, h_p, h_p), jnp.float32)
        bh_p = jnp.zeros((1, 1, h_p), jnp.float32)
    Wo, bo = params["W_o"]
    woa_p = _pad2(Wo[:atom_fdim], afd_p, h_p)     # concat([f_atoms, agg]) @ Wo
    wom_p = _pad2(Wo[atom_fdim:], h_p, h_p)       #   == f_atoms@Wo_a + agg@Wo_m
    bo_p = _pad2(bo, 1, h_p)

    a2x_flat = a2x.astype(jnp.int32).reshape(-1)  # (n_dest * max_nb,), 1-D SMEM

    smem = pl.BlockSpec(memory_space=pltpu.MemorySpace.SMEM)
    vmem = pl.BlockSpec(memory_space=pltpu.MemorySpace.VMEM)
    cparams = pltpu.CompilerParams(vmem_limit_bytes=_vmem_limit_bytes())
    out_shape = jax.ShapeDtypeStruct((n_atoms_p, h_p), jnp.float32)

    # advisory cost estimate for the XLA scheduler
    flops = 2 * n_src_p * ifd_p * h_p
    flops += (depth - 1) * 2 * n_src_p * h_p * h_p
    flops += 2 * n_atoms_p * (afd_p + h_p) * h_p
    flops += depth * 3 * n_atoms * max_nb * h_p
    bytes_accessed = 4 * (f_in_p.size + f_atoms_p.size + wi_p.size + bi_p.size
                          + wh_p.size + bh_p.size + woa_p.size + wom_p.size
                          + bo_p.size + n_atoms_p * h_p + a2x_flat.size)
    cost = pl.CostEstimate(flops=int(flops), transcendentals=0,
                           bytes_accessed=int(bytes_accessed))

    if atom_messages:
        kernel = functools.partial(_atom_encoder_kernel, depth=depth,
                                   max_nb=max_nb, n_atoms=n_atoms)
        args = (a2x_flat, f_in_p, f_atoms_p, wi_p, bi_p, wh_p, bh_p,
                woa_p, wom_p, bo_p)
        in_specs = [smem] + [vmem] * 9
        scratch = [pltpu.VMEM((n_src_p, h_p), jnp.float32),    # inp
                   pltpu.VMEM((n_src_p, h_p), jnp.float32),    # message
                   pltpu.VMEM((n_atoms_p, h_p), jnp.float32)]  # agg
    else:
        kernel = functools.partial(_bond_encoder_kernel, depth=depth,
                                   max_nb=max_nb, n_atoms=n_atoms, n_bonds=n_src)
        args = (a2x_flat, b2a.astype(jnp.int32), b2revb.astype(jnp.int32),
                f_in_p, f_atoms_p, wi_p, bi_p, wh_p, bh_p,
                woa_p, wom_p, bo_p)
        in_specs = [smem] * 3 + [vmem] * 9
        scratch = [pltpu.VMEM((n_src_p, h_p), jnp.float32),    # inp
                   pltpu.VMEM((n_src_p, h_p), jnp.float32),    # message
                   pltpu.VMEM((n_atoms_p, h_p), jnp.float32),  # per-atom agg
                   pltpu.VMEM((n_src_p, h_p), jnp.float32)]    # per-bond m_in

    hiddens_p = pl.pallas_call(
        kernel,
        out_shape=out_shape,
        in_specs=in_specs,
        out_specs=vmem,
        scratch_shapes=scratch,
        compiler_params=cparams,
        cost_estimate=cost,
    )(*args)

    atom_hiddens = hiddens_p[:n_atoms, :hidden]
    return readout(atom_hiddens, a_scope)


def mpn_forward(params_atom, params_bond, graph, depth):
    atom_vecs, atom_mask = mpn_encoder_forward(
        params_atom,
        f_input=graph["f_atoms"], f_atoms=graph["f_atoms"],
        a2x=graph["a2a"], a_scope=graph["a_scope"],
        atom_messages=True, depth=depth)
    bond_vecs, bond_mask = mpn_encoder_forward(
        params_bond,
        f_input=graph["f_bonds"], f_atoms=graph["f_atoms"],
        a2x=graph["a2b"], a_scope=graph["a_scope"],
        atom_messages=False, depth=depth,
        b2a=graph["b2a"], b2revb=graph["b2revb"])
    return atom_vecs, atom_mask, bond_vecs, bond_mask


# --------------------------- pure-JAX reference ----------------------------

def encoder_ref(params, *, f_input, f_atoms, a2x, a_scope, atom_messages,
                depth, b2a=None, b2revb=None):
    relu = lambda x: jnp.maximum(x, 0.0)
    Wi, bi = params["W_i"]
    inp = relu(f_input @ Wi + bi)
    message = inp
    for d in range(depth - 1):
        nei = message[a2x]                        # (rows, nb, H)
        agg = nei.sum(axis=1) * nei.max(axis=1)
        if atom_messages:
            m_in = agg
        else:
            m_in = agg[b2a] - message[b2revb]
        Wh, bh = params[f"W_h_{d}"]
        message = relu(inp + m_in @ Wh + bh)
    nei = message[a2x]
    agg = nei.sum(axis=1) * nei.max(axis=1)
    Wo, bo = params["W_o"]
    atom_hiddens = relu(jnp.concatenate([f_atoms, agg], axis=1) @ Wo + bo)
    return readout(atom_hiddens, a_scope)


# --------------------------------- main ------------------------------------

def make_linear_params(key, in_dim, out_dim, bias):
    kw, kb = jax.random.split(key)
    W = jax.random.normal(kw, (in_dim, out_dim), jnp.float32) * 0.1
    if bias:
        b = jax.random.normal(kb, (1, out_dim), jnp.float32) * 0.1
    else:
        b = jnp.zeros((1, out_dim), jnp.float32)   # no-bias layers: add zero
    return W, b


if __name__ == "__main__":
    # ---- model config (mirrors Namespace args / chemprop defaults) ----
    HIDDEN = 32
    DEPTH = 3
    ATOM_FDIM = 16
    BOND_ONLY_FDIM = 8
    BOND_FDIM = ATOM_FDIM + BOND_ONLY_FDIM   # get_bond_fdim(atom_messages=False)
    USE_BIAS = False                         # args.bias for W_i / W_h; W_o has bias

    # ---- deterministic synthetic BatchMolGraph (2 molecules) ----
    key = jax.random.PRNGKey(0)
    ks = jax.random.split(key, 16)
    n_atoms, n_bonds, max_nb = 8, 11, 3      # row 0 of each is the padding row

    f_atoms = jax.random.normal(ks[0], (n_atoms, ATOM_FDIM), jnp.float32)
    f_atoms = f_atoms.at[0].set(0.0)
    f_bonds = jax.random.normal(ks[1], (n_bonds, BOND_FDIM), jnp.float32)
    f_bonds = f_bonds.at[0].set(0.0)

    a2a = jax.random.randint(ks[2], (n_atoms, max_nb), 0, n_atoms, jnp.int32)
    a2a = a2a.at[0].set(0)
    a2b = jax.random.randint(ks[3], (n_atoms, max_nb), 0, n_bonds, jnp.int32)
    a2b = a2b.at[0].set(0)
    b2a = jax.random.randint(ks[4], (n_bonds,), 0, n_atoms, jnp.int32).at[0].set(0)
    b2revb = jax.random.randint(ks[5], (n_bonds,), 0, n_bonds, jnp.int32).at[0].set(0)
    a_scope = [(1, 4), (5, 3)]               # (start, size) per molecule

    graph = dict(f_atoms=f_atoms, f_bonds=f_bonds, a2a=a2a, a2b=a2b,
                 b2a=b2a, b2revb=b2revb, a_scope=a_scope)

    # ---- deterministic parameters ----
    def make_encoder_params(base_key, input_dim):
        kk = jax.random.split(base_key, DEPTH + 2)
        p = {"W_i": make_linear_params(kk[0], input_dim, HIDDEN, USE_BIAS)}
        for d in range(DEPTH - 1):
            p[f"W_h_{d}"] = make_linear_params(kk[1 + d], HIDDEN, HIDDEN, USE_BIAS)
        p["W_o"] = make_linear_params(kk[DEPTH], ATOM_FDIM + HIDDEN, HIDDEN, True)
        return p

    params_atom = make_encoder_params(ks[6], ATOM_FDIM)   # encoder_atom
    params_bond = make_encoder_params(ks[7], BOND_FDIM)   # encoder_bond

    # ---- run fused Pallas implementation ----
    atom_vecs, atom_mask, bond_vecs, bond_mask = mpn_forward(
        params_atom, params_bond, graph, DEPTH)
    jax.block_until_ready((atom_vecs, atom_mask, bond_vecs, bond_mask))

    # ---- verify against pure-JAX reference ----
    ref_av, ref_am = encoder_ref(params_atom, f_input=f_atoms, f_atoms=f_atoms,
                                 a2x=a2a, a_scope=a_scope, atom_messages=True,
                                 depth=DEPTH)
    ref_bv, ref_bm = encoder_ref(params_bond, f_input=f_bonds, f_atoms=f_atoms,
                                 a2x=a2b, a_scope=a_scope, atom_messages=False,
                                 depth=DEPTH, b2a=b2a, b2revb=b2revb)
    assert jnp.allclose(atom_vecs, ref_av, atol=1e-4, rtol=1e-4)
    assert jnp.allclose(atom_mask, ref_am)
    assert jnp.allclose(bond_vecs, ref_bv, atol=1e-4, rtol=1e-4)
    assert jnp.allclose(bond_mask, ref_bm)

    print("KERNEL_OK")
</pallas_src>

<mosaic_0001>
module attributes {stable_mosaic.version = 11 : i64} {
  func.func @_atom_encoder_kernel(%arg0: memref<24xi32, #tpu.memory_space<smem>>, %arg1: memref<8x128xf32, #tpu.memory_space<vmem>>, %arg2: memref<8x128xf32, #tpu.memory_space<vmem>>, %arg3: memref<128x128xf32, #tpu.memory_space<vmem>>, %arg4: memref<1x128xf32, #tpu.memory_space<vmem>>, %arg5: memref<2x128x128xf32, #tpu.memory_space<vmem>>, %arg6: memref<2x1x128xf32, #tpu.memory_space<vmem>>, %arg7: memref<128x128xf32, #tpu.memory_space<vmem>>, %arg8: memref<128x128xf32, #tpu.memory_space<vmem>>, %arg9: memref<1x128xf32, #tpu.memory_space<vmem>>, %arg10: memref<8x128xf32, #tpu.memory_space<vmem>>, %arg11: memref<8x128xf32, #tpu.memory_space<vmem>>, %arg12: memref<8x128xf32, #tpu.memory_space<vmem>>, %arg13: memref<8x128xf32, #tpu.memory_space<vmem>>) attributes {dimension_semantics = [], scalar_prefetch = 0 : i64, scratch_operands = 3 : i64, tpu.core_type = #tpu.core_type<tc>} {
    %c0 = arith.constant 0 : index
    %c0_0 = arith.constant 0 : index
    %0 = vector.load %arg1[%c0, %c0_0] : memref<8x128xf32, #tpu.memory_space<vmem>>, vector<8x128xf32>
    %c0_1 = arith.constant 0 : index
    %c0_2 = arith.constant 0 : index
    %1 = vector.load %arg3[%c0_1, %c0_2] : memref<128x128xf32, #tpu.memory_space<vmem>>, vector<128x128xf32>
    %cst = arith.constant dense<0.000000e+00> : vector<8x128xf32>
    %2 = tpu.matmul %0, %1, %cst {dimension_numbers = #tpu.dot_dimension_numbers<[1], [0], [0], [1], [0, 0, 1, 1], [], []>} : vector<8x128xf32>, vector<128x128xf32>, vector<8x128xf32> -> vector<8x128xf32>
    %c0_3 = arith.constant 0 : index
    %c0_4 = arith.constant 0 : index
    %3 = vector.load %arg4[%c0_3, %c0_4] : memref<1x128xf32, #tpu.memory_space<vmem>>, vector<1x128xf32>
    %4 = vector.broadcast %3 : vector<1x128xf32> to vector<8x128xf32>
    %5 = arith.addf %2, %4 : vector<8x128xf32>
    %cst_5 = arith.constant 0.000000e+00 : f32
    %6 = vector.broadcast %cst_5 : f32 to vector<8x128xf32>
    %7 = arith.maximumf %5, %6 : vector<8x128xf32>
    %c0_6 = arith.constant 0 : index
    %c0_7 = arith.constant 0 : index
    %8 = vector.load %arg11[%c0_6, %c0_7] : memref<8x128xf32, #tpu.memory_space<vmem>>, vector<8x128xf32>
    tpu.vector_store %arg11[%c0_6, %c0_7], %7 {strides = array<i32>} : memref<8x128xf32, #tpu.memory_space<vmem>>, vector<8x128xf32>,
    %c0_8 = arith.constant 0 : index
    %c0_9 = arith.constant 0 : index
    %9 = vector.load %arg12[%c0_8, %c0_9] : memref<8x128xf32, #tpu.memory_space<vmem>>, vector<8x128xf32>
    tpu.vector_store %arg12[%c0_8, %c0_9], %7 {strides = array<i32>} : memref<8x128xf32, #tpu.memory_space<vmem>>, vector<8x128xf32>,
    %cst_10 = arith.constant 0.000000e+00 : f32
    %10 = vector.broadcast %cst_10 : f32 to vector<8x128xf32>
    %c0_11 = arith.constant 0 : index
    %c0_12 = arith.constant 0 : index
    %11 = vector.load %arg13[%c0_11, %c0_12] : memref<8x128xf32, #tpu.memory_space<vmem>>, vector<8x128xf32>
    tpu.vector_store %arg13[%c0_11, %c0_12], %10 {strides = array<i32>} : memref<8x128xf32, #tpu.memory_space<vmem>>, vector<8x128xf32>,
    %c0_i32 = arith.constant 0 : i32
    %c8_i32 = arith.constant 8 : i32
    %12 = arith.addi %c0_i32, %c8_i32 : i32
    %c1_i32 = arith.constant 1 : i32
    scf.for %arg14 = %c0_i32 to %12 step %c1_i32  : i32 {
      %c3_i32 = arith.constant 3 : i32
      %54 = arith.muli %arg14, %c3_i32 : i32
      %55 = arith.index_cast %54 : i32 to index
      %56 = memref.load %arg0[%55] : memref<24xi32, #tpu.memory_space<smem>>
      %57 = arith.index_cast %56 : i32 to index
      %c0_64 = arith.constant 0 : index
      %58 = vector.load %arg12[%57, %c0_64] : memref<8x128xf32, #tpu.memory_space<vmem>>, vector<1x128xf32>
      %c3_i32_65 = arith.constant 3 : i32
      %59 = arith.muli %arg14, %c3_i32_65 : i32
      %c1_i32_66 = arith.constant 1 : i32
      %60 = arith.addi %59, %c1_i32_66 : i32
      %61 = arith.index_cast %60 : i32 to index
      %62 = memref.load %arg0[%61] : memref<24xi32, #tpu.memory_space<smem>>
      %63 = arith.index_cast %62 : i32 to index
      %c0_67 = arith.constant 0 : index
      %64 = vector.load %arg12[%63, %c0_67] : memref<8x128xf32, #tpu.memory_space<vmem>>, vector<1x128xf32>
      %65 = arith.addf %58, %64 : vector<1x128xf32>
      %66 = arith.maximumf %58, %64 : vector<1x128xf32>
      %c3_i32_68 = arith.constant 3 : i32
      %67 = arith.muli %arg14, %c3_i32_68 : i32
      %c2_i32 = arith.constant 2 : i32
      %68 = arith.addi %67, %c2_i32 : i32
      %69 = arith.index_cast %68 : i32 to index
      %70 = memref.load %arg0[%69] : memref<24xi32, #tpu.memory_space<smem>>
      %71 = arith.index_cast %70 : i32 to index
      %c0_69 = arith.constant 0 : index
      %72 = vector.load %arg12[%71, %c0_69] : memref<8x128xf32, #tpu.memory_space<vmem>>, vector<1x128xf32>
      %73 = arith.addf %65, %72 : vector<1x128xf32>
      %74 = arith.maximumf %66, %72 : vector<1x128xf32>
      %75 = arith.mulf %73, %74 : vector<1x128xf32>
      %76 = arith.index_cast %arg14 : i32 to index
      %c0_70 = arith.constant 0 : index
      %77 = vector.load %arg13[%76, %c0_70] : memref<8x128xf32, #tpu.memory_space<vmem>>, vector<1x128xf32>
      tpu.vector_store %arg13[%76, %c0_70], %75 {strides = array<i32>} : memref<8x128xf32, #tpu.memory_space<vmem>>, vector<1x128xf32>,
    }
    %c8_i32_13 = arith.constant 8 : i32
    %c0_14 = arith.constant 0 : index
    %c0_15 = arith.constant 0 : index
    %13 = vector.load %arg13[%c0_14, %c0_15] : memref<8x128xf32, #tpu.memory_space<vmem>>, vector<8x128xf32>
    %c0_16 = arith.constant 0 : index
    %c0_17 = arith.constant 0 : index
    %c0_18 = arith.constant 0 : index
    %14 = vector.load %arg5[%c0_16, %c0_17, %c0_18] : memref<2x128x128xf32, #tpu.memory_space<vmem>>, vector<1x128x128xf32>
    %15 = vector.shape_cast %14 : vector<1x128x128xf32> to vector<128x128xf32>
    %cst_19 = arith.constant dense<0.000000e+00> : vector<8x128xf32>
    %16 = tpu.matmul %13, %15, %cst_19 {dimension_numbers = #tpu.dot_dimension_numbers<[1], [0], [0], [1], [0, 0, 1, 1], [], []>} : vector<8x128xf32>, vector<128x128xf32>, vector<8x128xf32> -> vector<8x128xf32>
    %c0_20 = arith.constant 0 : index
    %c0_21 = arith.constant 0 : index
    %c0_22 = arith.constant 0 : index
    %17 = vector.load %arg6[%c0_20, %c0_21, %c0_22] : memref<2x1x128xf32, #tpu.memory_space<vmem>>, vector<1x1x128xf32>
    %18 = vector.shape_cast %17 : vector<1x1x128xf32> to vector<1x128xf32>
    %19 = vector.broadcast %18 : vector<1x128xf32> to vector<8x128xf32>
    %20 = arith.addf %16, %19 : vector<8x128xf32>
    %c0_23 = arith.constant 0 : index
    %c0_24 = arith.constant 0 : index
    %21 = vector.load %arg11[%c0_23, %c0_24] : memref<8x128xf32, #tpu.memory_space<vmem>>, vector<8x128xf32>
    %22 = arith.addf %21, %20 : vector<8x128xf32>
    %cst_25 = arith.constant 0.000000e+00 : f32
    %23 = vector.broadcast %cst_25 : f32 to vector<8x128xf32>
    %24 = arith.maximumf %22, %23 : vector<8x128xf32>
    %c0_26 = arith.constant 0 : index
    %c0_27 = arith.constant 0 : index
    %25 = vector.load %arg12[%c0_26, %c0_27] : memref<8x128xf32, #tpu.memory_space<vmem>>, vector<8x128xf32>
    tpu.vector_store %arg12[%c0_26, %c0_27], %24 {strides = array<i32>} : memref<8x128xf32, #tpu.memory_space<vmem>>, vector<8x128xf32>,
    %c0_i32_28 = arith.constant 0 : i32
    %c8_i32_29 = arith.constant 8 : i32
    %26 = arith.addi %c0_i32_28, %c8_i32_29 : i32
    %c1_i32_30 = arith.constant 1 : i32
    scf.for %arg14 = %c0_i32_28 to %26 step %c1_i32_30  : i32 {
      %c3_i32 = arith.constant 3 : i32
      %54 = arith.muli %arg14, %c3_i32 : i32
      %55 = arith.index_cast %54 : i32 to index
      %56 = memref.load %arg0[%55] : memref<24xi32, #tpu.memory_space<smem>>
      %57 = arith.index_cast %56 : i32 to index
      %c0_64 = arith.constant 0 : index
      %58 = vector.load %arg12[%57, %c0_64] : memref<8x128xf32, #tpu.memory_space<vmem>>, vector<1x128xf32>
      %c3_i32_65 = arith.constant 3 : i32
      %59 = arith.muli %arg14, %c3_i32_65 : i32
      %c1_i32_66 = arith.constant 1 : i32
      %60 = arith.addi %59, %c1_i32_66 : i32
      %61 = arith.index_cast %60 : i32 to index
      %62 = memref.load %arg0[%61] : memref<24xi32, #tpu.memory_space<smem>>
      %63 = arith.index_cast %62 : i32 to index
      %c0_67 = arith.constant 0 : index
      %64 = vector.load %arg12[%63, %c0_67] : memref<8x128xf32, #tpu.memory_space<vmem>>, vector<1x128xf32>
      %65 = arith.addf %58, %64 : vector<1x128xf32>
      %66 = arith.maximumf %58, %64 : vector<1x128xf32>
      %c3_i32_68 = arith.constant 3 : i32
      %67 = arith.muli %arg14, %c3_i32_68 : i32
      %c2_i32 = arith.constant 2 : i32
      %68 = arith.addi %67, %c2_i32 : i32
      %69 = arith.index_cast %68 : i32 to index
      %70 = memref.load %arg0[%69] : memref<24xi32, #tpu.memory_space<smem>>
      %71 = arith.index_cast %70 : i32 to index
      %c0_69 = arith.constant 0 : index
      %72 = vector.load %arg12[%71, %c0_69] : memref<8x128xf32, #tpu.memory_space<vmem>>, vector<1x128xf32>
      %73 = arith.addf %65, %72 : vector<1x128xf32>
      %74 = arith.maximumf %66, %72 : vector<1x128xf32>
      %75 = arith.mulf %73, %74 : vector<1x128xf32>
      %76 = arith.index_cast %arg14 : i32 to index
      %c0_70 = arith.constant 0 : index
      %77 = vector.load %arg13[%76, %c0_70] : memref<8x128xf32, #tpu.memory_space<vmem>>, vector<1x128xf32>
      tpu.vector_store %arg13[%76, %c0_70], %75 {strides = array<i32>} : memref<8x128xf32, #tpu.memory_space<vmem>>, vector<1x128xf32>,
    }
    %c8_i32_31 = arith.constant 8 : i32
    %c0_32 = arith.constant 0 : index
    %c0_33 = arith.constant 0 : index
    %27 = vector.load %arg13[%c0_32, %c0_33] : memref<8x128xf32, #tpu.memory_space<vmem>>, vector<8x128xf32>
    %c1 = arith.constant 1 : index
    %c0_34 = arith.constant 0 : index
    %c0_35 = arith.constant 0 : index
    %28 = vector.load %arg5[%c1, %c0_34, %c0_35] : memref<2x128x128xf32, #tpu.memory_space<vmem>>, vector<1x128x128xf32>
    %29 = vector.shape_cast %28 : vector<1x128x128xf32> to vector<128x128xf32>
    %cst_36 = arith.constant dense<0.000000e+00> : vector<8x128xf32>
    %30 = tpu.matmul %27, %29, %cst_36 {dimension_numbers = #tpu.dot_dimension_numbers<[1], [0], [0], [1], [0, 0, 1, 1], [], []>} : vector<8x128xf32>, vector<128x128xf32>, vector<8x128xf32> -> vector<8x128xf32>
    %c1_37 = arith.constant 1 : index
    %c0_38 = arith.constant 0 : index
    %c0_39 = arith.constant 0 : index
    %31 = vector.load %arg6[%c1_37, %c0_38, %c0_39] : memref<2x1x128xf32, #tpu.memory_space<vmem>>, vector<1x1x128xf32>
    %32 = vector.shape_cast %31 : vector<1x1x128xf32> to vector<1x128xf32>
    %33 = vector.broadcast %32 : vector<1x128xf32> to vector<8x128xf32>
    %34 = arith.addf %30, %33 : vector<8x128xf32>
    %c0_40 = arith.constant 0 : index
    %c0_41 = arith.constant 0 : index
    %35 = vector.load %arg11[%c0_40, %c0_41] : memref<8x128xf32, #tpu.memory_space<vmem>>, vector<8x128xf32>
    %36 = arith.addf %35, %34 : vector<8x128xf32>
    %cst_42 = arith.constant 0.000000e+00 : f32
    %37 = vector.broadcast %cst_42 : f32 to vector<8x128xf32>
    %38 = arith.maximumf %36, %37 : vector<8x128xf32>
    %c0_43 = arith.constant 0 : index
    %c0_44 = arith.constant 0 : index
    %39 = vector.load %arg12[%c0_43, %c0_44] : memref<8x128xf32, #tpu.memory_space<vmem>>, vector<8x128xf32>
    tpu.vector_store %arg12[%c0_43, %c0_44], %38 {strides = array<i32>} : memref<8x128xf32, #tpu.memory_space<vmem>>, vector<8x128xf32>,
    %c0_i32_45 = arith.constant 0 : i32
    %c8_i32_46 = arith.constant 8 : i32
    %40 = arith.addi %c0_i32_45, %c8_i32_46 : i32
    %c1_i32_47 = arith.constant 1 : i32
    scf.for %arg14 = %c0_i32_45 to %40 step %c1_i32_47  : i32 {
      %c3_i32 = arith.constant 3 : i32
      %54 = arith.muli %arg14, %c3_i32 : i32
      %55 = arith.index_cast %54 : i32 to index
      %56 = memref.load %arg0[%55] : memref<24xi32, #tpu.memory_space<smem>>
      %57 = arith.index_cast %56 : i32 to index
      %c0_64 = arith.constant 0 : index
      %58 = vector.load %arg12[%57, %c0_64] : memref<8x128xf32, #tpu.memory_space<vmem>>, vector<1x128xf32>
      %c3_i32_65 = arith.constant 3 : i32
      %59 = arith.muli %arg14, %c3_i32_65 : i32
      %c1_i32_66 = arith.constant 1 : i32
      %60 = arith.addi %59, %c1_i32_66 : i32
      %61 = arith.index_cast %60 : i32 to index
      %62 = memref.load %arg0[%61] : memref<24xi32, #tpu.memory_space<smem>>
      %63 = arith.index_cast %62 : i32 to index
      %c0_67 = arith.constant 0 : index
      %64 = vector.load %arg12[%63, %c0_67] : memref<8x128xf32, #tpu.memory_space<vmem>>, vector<1x128xf32>
      %65 = arith.addf %58, %64 : vector<1x128xf32>
      %66 = arith.maximumf %58, %64 : vector<1x128xf32>
      %c3_i32_68 = arith.constant 3 : i32
      %67 = arith.muli %arg14, %c3_i32_68 : i32
      %c2_i32 = arith.constant 2 : i32
      %68 = arith.addi %67, %c2_i32 : i32
      %69 = arith.index_cast %68 : i32 to index
      %70 = memref.load %arg0[%69] : memref<24xi32, #tpu.memory_space<smem>>
      %71 = arith.index_cast %70 : i32 to index
      %c0_69 = arith.constant 0 : index
      %72 = vector.load %arg12[%71, %c0_69] : memref<8x128xf32, #tpu.memory_space<vmem>>, vector<1x128xf32>
      %73 = arith.addf %65, %72 : vector<1x128xf32>
      %74 = arith.maximumf %66, %72 : vector<1x128xf32>
      %75 = arith.mulf %73, %74 : vector<1x128xf32>
      %76 = arith.index_cast %arg14 : i32 to index
      %c0_70 = arith.constant 0 : index
      %77 = vector.load %arg13[%76, %c0_70] : memref<8x128xf32, #tpu.memory_space<vmem>>, vector<1x128xf32>
      tpu.vector_store %arg13[%76, %c0_70], %75 {strides = array<i32>} : memref<8x128xf32, #tpu.memory_space<vmem>>, vector<1x128xf32>,
    }
    %c8_i32_48 = arith.constant 8 : i32
    %c0_49 = arith.constant 0 : index
    %c0_50 = arith.constant 0 : index
    %41 = vector.load %arg2[%c0_49, %c0_50] : memref<8x128xf32, #tpu.memory_space<vmem>>, vector<8x128xf32>
    %c0_51 = arith.constant 0 : index
    %c0_52 = arith.constant 0 : index
    %42 = vector.load %arg7[%c0_51, %c0_52] : memref<128x128xf32, #tpu.memory_space<vmem>>, vector<128x128xf32>
    %cst_53 = arith.constant dense<0.000000e+00> : vector<8x128xf32>
    %43 = tpu.matmul %41, %42, %cst_53 {dimension_numbers = #tpu.dot_dimension_numbers<[1], [0], [0], [1], [0, 0, 1, 1], [], []>} : vector<8x128xf32>, vector<128x128xf32>, vector<8x128xf32> -> vector<8x128xf32>
    %c0_54 = arith.constant 0 : index
    %c0_55 = arith.constant 0 : index
    %44 = vector.load %arg13[%c0_54, %c0_55] : memref<8x128xf32, #tpu.memory_space<vmem>>, vector<8x128xf32>
    %c0_56 = arith.constant 0 : index
    %c0_57 = arith.constant 0 : index
    %45 = vector.load %arg8[%c0_56, %c0_57] : memref<128x128xf32, #tpu.memory_space<vmem>>, vector<128x128xf32>
    %cst_58 = arith.constant dense<0.000000e+00> : vector<8x128xf32>
    %46 = tpu.matmul %44, %45, %cst_58 {dimension_numbers = #tpu.dot_dimension_numbers<[1], [0], [0], [1], [0, 0, 1, 1], [], []>} : vector<8x128xf32>, vector<128x128xf32>, vector<8x128xf32> -> vector<8x128xf32>
    %47 = arith.addf %43, %46 : vector<8x128xf32>
    %c0_59 = arith.constant 0 : index
    %c0_60 = arith.constant 0 : index
    %48 = vector.load %arg9[%c0_59, %c0_60] : memref<1x128xf32, #tpu.memory_space<vmem>>, vector<1x128xf32>
    %49 = vector.broadcast %48 : vector<1x128xf32> to vector<8x128xf32>
    %50 = arith.addf %47, %49 : vector<8x128xf32>
    %cst_61 = arith.constant 0.000000e+00 : f32
    %51 = vector.broadcast %cst_61 : f32 to vector<8x128xf32>
    %52 = arith.maximumf %50, %51 : vector<8x128xf32>
    %c0_62 = arith.constant 0 : index
    %c0_63 = arith.constant 0 : index
    %53 = vector.load %arg10[%c0_62, %c0_63] : memref<8x128xf32, #tpu.memory_space<vmem>>, vector<8x128xf32>
    tpu.vector_store %arg10[%c0_62, %c0_63], %52 {strides = array<i32>} : memref<8x128xf32, #tpu.memory_space<vmem>>, vector<8x128xf32>,
    return
  }
}

</mosaic_0001>

<bundles_post_ra>
// kernel: tpu_custom_call.1
= control target key start
LH: loop header
LB: loop body
LE: loop exit
PB: predicated region body
PF: predicated region fallthrough
CT: control target
= control target key end

     0   :  { %15 = vsyncpa [#allocation8], 0  ;;  %s1587_s0 = inlined_call_operand.hbm [shape: s32[24], index: 0, kind: input, shape index: {}]   ;;  %s1588_s1 = inlined_call_operand.hbm [shape: f32[8,128], index: 1, kind: input, shape index: {}]   ;;  %s1589_s2 = inlined_call_operand.hbm [shape: f32[8,128], index: 2, kind: input, shape index: {}]   ;;  %s1590_s3 = inlined_call_operand.hbm [shape: f32[128,128], index: 3, kind: input, shape index: {}]   ;;  %s1591_s4 = inlined_call_operand.vmem [shape: f32[1,128], index: 4, kind: input, shape index: {}]   ;;  %s1592_s5 = inlined_call_operand.hbm [shape: f32[2,128,128], index: 5, kind: input, shape index: {}]   ;;  %s1593_s6 = inlined_call_operand.vmem [shape: f32[2,1,128], index: 6, kind: input, shape index: {}]   ;;  %s1594_s7 = inlined_call_operand.hbm [shape: f32[128,128], index: 7, kind: input, shape index: {}]   ;;  %s1595_s8 = inlined_call_operand.hbm [shape: f32[128,128], index: 8, kind: input, shape index: {}]   ;;  %s1596_s9 = inlined_call_operand.vmem [shape: f32[1,128], index: 9, kind: input, shape index: {}]   ;;  %s1597_s10 = inlined_call_operand.hbm [shape: f32[8,128], index: 10, kind: output, shape index: {}]  }
   0x1   :  { %16 = vsyncpa [#allocation6], 0 }
   0x2   :  { %17 = vsyncpa [#allocation11], 0 }
   0x3   :  { %18 = vsyncpa [#allocation14], 0 }
   0x4   :  { %19 = vsyncpa [#allocation17], 0 }
   0x5   :  { %20 = vsyncpa [#allocation7], 0  ;;  %s1348_s13 = smov [#allocation10]   ;;  %s1148_s17 = scalar_lea.hbm %s1589_s2, 128 }
   0x6   :  { %s45_s14 = sshll.u32 %s1348_s13, 4  ;;  %p1149_p0 = scmp.ne.s32.totalorder %s1589_s2, %s1148_s17  ;;  %s46_s14 = int_to_ptr.vmem [resolvable:$true] %s45_s14 }
   0x7   :  { %p1152_p1 = scmp.lt.u32.totalorder %s1148_s17, %s1589_s2 }
   0x9   :  { %p1154_p2 = pnand %p1152_p1, %p1149_p0 }
   0xb   :  { %1157 = shalt.err (!%p1154_p2)
}
   0xc   :  { %s1158_s22 = scalar_lea.vmem %s46_s14, 128  ;;  %p1163_p4 = scmp.lt.s32.totalorder %s46_s14, %s46_s14 }
   0xd   :  { %p1159_p3 = scmp.ne.s32.totalorder %s46_s14, %s1158_s22  ;;  %p1164_p5 = scmp.lt.s32.totalorder %s1158_s22, %s1158_s22 }
   0xf   :  { %p1165_p6 = por %p1164_p5, %p1163_p4 }
  0x11   :  { %p1166_p7 = pnand %p1165_p6, %p1159_p3 }
  0x13   :  { %1169 = shalt.err (!%p1166_p7)
}
  0x14   :  { %48 = dma.hbm_to_vmem [thread:$0]  %s1589_s2, 128, %s46_s14, [#allocation11]  }
  0x15   :  { %s1349_s25 = smov [#allocation13]   ;;  %s1170_s29 = scalar_lea.hbm %s1592_s5, 4096 }
  0x16   :  { %s68_s26 = sshll.u32 %s1349_s25, 4  ;;  %p1171_p8 = scmp.ne.s32.totalorder %s1592_s5, %s1170_s29  ;;  %s69_s26 = int_to_ptr.vmem [resolvable:$true] %s68_s26 }
  0x17   :  { %p1174_p9 = scmp.lt.u32.totalorder %s1170_s29, %s1592_s5 }
  0x19   :  { %p1176_p10 = pnand %p1174_p9, %p1171_p8 }
  0x1b   :  { %1179 = shalt.err (!%p1176_p10)
}
  0x1c   :  { %s1180_s15 = scalar_lea.vmem %s69_s26, 4096  ;;  %p1185_p12 = scmp.lt.s32.totalorder %s69_s26, %s69_s26 }
  0x1d   :  { %p1181_p11 = scmp.ne.s32.totalorder %s69_s26, %s1180_s15  ;;  %p1186_p13 = scmp.lt.s32.totalorder %s1180_s15, %s1180_s15 }
  0x1f   :  { %p1187_p0 = por %p1186_p13, %p1185_p12 }
  0x21   :  { %p1188_p1 = pnand %p1187_p0, %p1181_p11 }
  0x23   :  { %1191 = shalt.err (!%p1188_p1)
}
  0x24   :  { %s1350_s2 = smov 128   ;;  %s1351_s14 = smov 8  }
  0x25   :  { %74 = dma.hbm_to_vmem [thread:$0]  %s1592_s5, 4096, %s69_s26, [#allocation14], %s1350_s2, %s1350_s2, %s1351_s14  }
  0x26   :  { %s1192_s20 = scalar_lea.hbm %s1587_s0, 16 }
  0x27   :  { %p1193_p2 = scmp.ne.s32.totalorder %s1587_s0, %s1192_s20  ;;  %p1196_p3 = scmp.lt.u32.totalorder %s1192_s20, %s1587_s0 }
  0x29   :  { %p1198_p4 = pnand %p1196_p3, %p1193_p2 }
  0x2b   :  { %1201 = shalt.err (!%p1198_p4)
}
  0x2c   :  { %s1352_s25 = smov [#allocation5]   ;;  %s1353_s5 = smov [#allocation9]  }
  0x2d   :  { %28 = dma.hbm_to_smem %s1587_s0, 16, %s1352_s25, [#allocation8]  }
  0x2e   :  { %s35_s26 = sshll.u32 %s1353_s5, 4  ;;  %s1354_s29 = smov [#allocation12]   ;;  %s36_s26 = int_to_ptr.vmem [resolvable:$true] %s35_s26 }
  0x2f   :  { %s54_s30 = sshll.u32 %s1354_s29, 4  ;;  %s1202_s13 = scalar_lea.hbm %s1588_s1, 128  ;;  %s55_s30 = int_to_ptr.vmem [resolvable:$true] %s54_s30 }
  0x30   :  { %p1203_p5 = scmp.ne.s32.totalorder %s1588_s1, %s1202_s13  ;;  %p1206_p6 = scmp.lt.u32.totalorder %s1202_s13, %s1588_s1 }
  0x32   :  { %p1208_p7 = pnand %p1206_p6, %p1203_p5 }
  0x34   :  { %1211 = shalt.err (!%p1208_p7)
}
  0x35   :  { %s1212_s0 = scalar_lea.vmem %s36_s26, 128  ;;  %p1217_p9 = scmp.lt.s32.totalorder %s36_s26, %s36_s26 }
  0x36   :  { %p1213_p8 = scmp.ne.s32.totalorder %s36_s26, %s1212_s0  ;;  %p1218_p10 = scmp.lt.s32.totalorder %s1212_s0, %s1212_s0 }
  0x38   :  { %p1219_p11 = por %p1218_p10, %p1217_p9 }
  0x3a   :  { %p1220_p12 = pnand %p1219_p11, %p1213_p8 }
  0x3c   :  { %1223 = shalt.err (!%p1220_p12)
}
  0x3d   :  { %38 = dma.hbm_to_vmem [thread:$0]  %s1588_s1, 128, %s36_s26, [#allocation6]  }
  0x3e   :  { %s1224_s23 = scalar_lea.hbm %s1590_s3, 2048 }
  0x3f   :  { %p1225_p13 = scmp.ne.s32.totalorder %s1590_s3, %s1224_s23  ;;  %p1228_p0 = scmp.lt.u32.totalorder %s1224_s23, %s1590_s3 }
  0x41   :  { %p1230_p1 = pnand %p1228_p0, %p1225_p13 }
  0x43   :  { %1233 = shalt.err (!%p1230_p1)
}
  0x44   :  { %s1234_s5 = scalar_lea.vmem %s55_s30, 2048  ;;  %p1239_p3 = scmp.lt.s32.totalorder %s55_s30, %s55_s30 }
  0x45   :  { %p1235_p2 = scmp.ne.s32.totalorder %s55_s30, %s1234_s5  ;;  %p1240_p4 = scmp.lt.s32.totalorder %s1234_s5, %s1234_s5 }
  0x47   :  { %p1241_p5 = por %p1240_p4, %p1239_p3 }
  0x49   :  { %p1242_p6 = pnand %p1241_p5, %p1235_p2 }
  0x4b   :  { %1245 = shalt.err (!%p1242_p6)
}
  0x4c   :  { %60 = dma.hbm_to_vmem [thread:$0]  %s1590_s3, 2048, %s55_s30, [#allocation11], %s1350_s2, %s1350_s2, %s1351_s14  }
  0x4d   :  { %s1355_s29 = smov [#allocation15]   ;;  %s1356_s12 = smov [#allocation16]  }
  0x4e   :  { %s82_s11 = sshll.u32 %s1355_s29, 4  ;;  %s94_s13 = sshll.u32 %s1356_s12, 4  ;;  %s83_s11 = int_to_ptr.vmem [resolvable:$true] %s82_s11  ;;  %s95_s13 = int_to_ptr.vmem [resolvable:$true] %s94_s13 }
  0x4f   :  { %s1246_s17 = scalar_lea.hbm %s1594_s7, 2048 }
  0x50   :  { %p1247_p7 = scmp.ne.s32.totalorder %s1594_s7, %s1246_s17  ;;  %p1250_p8 = scmp.lt.u32.totalorder %s1246_s17, %s1594_s7 }
  0x52   :  { %p1252_p9 = pnand %p1250_p8, %p1247_p7 }
  0x54   :  { %1255 = shalt.err (!%p1252_p9)
}
  0x55   :  { %s1256_s3 = scalar_lea.vmem %s83_s11, 2048  ;;  %p1261_p11 = scmp.lt.s32.totalorder %s83_s11, %s83_s11 }
  0x56   :  { %p1257_p10 = scmp.ne.s32.totalorder %s83_s11, %s1256_s3  ;;  %p1262_p12 = scmp.lt.s32.totalorder %s1256_s3, %s1256_s3 }
  0x58   :  { %p1263_p13 = por %p1262_p12, %p1261_p11 }
  0x5a   :  { %p1264_p0 = pnand %p1263_p13, %p1257_p10 }
  0x5c   :  { %1267 = shalt.err (!%p1264_p0)
}
  0x5d   :  { %88 = dma.hbm_to_vmem [thread:$0]  %s1594_s7, 2048, %s83_s11, [#allocation14], %s1350_s2, %s1350_s2, %s1351_s14  }
  0x5e   :  { %s1268_s24 = scalar_lea.hbm %s1595_s8, 2048 }
  0x5f   :  { %p1269_p1 = scmp.ne.s32.totalorder %s1595_s8, %s1268_s24  ;;  %p1272_p2 = scmp.lt.u32.totalorder %s1268_s24, %s1595_s8 }
  0x61   :  { %p1274_p3 = pnand %p1272_p2, %p1269_p1 }
  0x63   :  { %1277 = shalt.err (!%p1274_p3)
}
  0x64   :  { %s1278_s1 = scalar_lea.vmem %s95_s13, 2048  ;;  %p1283_p5 = scmp.lt.s32.totalorder %s95_s13, %s95_s13 }
  0x65   :  { %p1279_p4 = scmp.ne.s32.totalorder %s95_s13, %s1278_s1  ;;  %p1284_p6 = scmp.lt.s32.totalorder %s1278_s1, %s1278_s1 }
  0x67   :  { %p1285_p7 = por %p1284_p6, %p1283_p5 }
  0x69   :  { %p1286_p8 = pnand %p1285_p7, %p1279_p4 }
  0x6b   :  { %1289 = shalt.err (!%p1286_p8)
}
  0x6c   :  { %100 = dma.hbm_to_vmem [thread:$0]  %s1595_s8, 2048, %s95_s13, [#allocation17], %s1350_s2, %s1350_s2, %s1351_s14  }
  0x6d   :  { %1324 = dma.done.wait [#allocation8], 16  }
  0x6e   :  { %1325 = vsyncadd [#allocation8], 4294967280 }
  0x6f   :  { %1326 = dma.done.wait [#allocation6], 128  }
  0x70   :  { %1327 = vsyncadd [#allocation6], 4294967168 }
  0x71   :  { %1328 = dma.done.wait [#allocation11], 2176  }
  0x72   :  { %1329 = vsyncadd [#allocation11], 4294965120 }
  0x73   :  { %1330 = dma.done.wait [#allocation14], 6144  }
  0x74   :  { %1331 = vsyncadd [#allocation14], 4294961152 }
  0x75   :  { %1332 = dma.done.wait [#allocation17], 2048  }
  0x76   :  { %1333 = vsyncadd [#allocation17], 4294965248 }
  0x77   :  { %124 = sfence }
  0x78   :  { %v126_v0 = vld [vmem:[#allocation12] sm:$0xff]  ;;  %v127_v1 = vld [vmem:[#allocation12 + $0x8] sm:$0xff]  ;;  %v128_v2 = vld [vmem:[#allocation12 + $0x10] sm:$0xff]  ;;  %v1357_v3 = vmov 0.0|0.0   ;;  %vm1358_vm0 = vmmov 0   ;;  %v1359_v6 = vmov 0.0  }
  0x79   :  { %991 = vmatprep.subr.bf16.mxu0 %v1357_v3  ;;  %v992_v4 = vpack.c.bf16 %v127_v1, %v126_v0  ;;  %v129_v5 = vld [vmem:[#allocation12 + $0x18] sm:$0xff]  ;;  %848 = vmatprep.mubr.msk.f32.mxu0 %vm1358_vm0, %v1359_v6  ;;  %222 = vst [vmem:[#allocation4] sm:$0xff] %v1359_v6  ;;  %v130_v8 = vld [vmem:[#allocation12 + $0x20] sm:$0xff]  ;;  %v131_v9 = vld [vmem:[#allocation12 + $0x28] sm:$0xff]  ;;  %s1336_s14 = smov 0  }
  0x7a   :  { %v995_v7 = vpack.c.bf16 %v129_v5, %v128_v2  ;;  %v998_v10 = vpack.c.bf16 %v131_v9, %v130_v8  ;;  %v132_v11 = vld [vmem:[#allocation12 + $0x30] sm:$0xff]  ;;  %v133_v12 = vld [vmem:[#allocation12 + $0x38] sm:$0xff]  ;;  %v134_v14 = vld [vmem:[#allocation12 + $0x40] sm:$0xff] }
  0x7b   :  { %993 = vmatpush3.bf16.msra.mxu0 %v992_v4  ;;  %v1001_v13 = vpack.c.bf16 %v133_v12, %v132_v11  ;;  %v135_v15 = vld [vmem:[#allocation12 + $0x48] sm:$0xff]  ;;  %v136_v17 = vld [vmem:[#allocation12 + $0x50] sm:$0xff]  ;;  %v137_v18 = vld [vmem:[#allocation12 + $0x58] sm:$0xff] }
  0x7c   :  { %994 = vmatprep.subr.bf16.mxu0 %v1357_v3  ;;  %v1004_v16 = vpack.c.bf16 %v135_v15, %v134_v14  ;;  %v1007_v19 = vpack.c.bf16 %v137_v18, %v136_v17  ;;  %v138_v20 = vld [vmem:[#allocation12 + $0x60] sm:$0xff]  ;;  %v139_v21 = vld [vmem:[#allocation12 + $0x68] sm:$0xff]  ;;  %v140_v23 = vld [vmem:[#allocation12 + $0x70] sm:$0xff] }
  0x7d   :  { %v1010_v22 = vpack.c.bf16 %v139_v21, %v138_v20  ;;  %v141_v24 = vld [vmem:[#allocation12 + $0x78] sm:$0xff]  ;;  %v125_v26 = vld [vmem:[#allocation9] sm:$0xff] }
  0x7e   :  { %v1013_v25 = vpack.c.bf16 %v141_v24, %v140_v23  ;;  %v726_v27 = vld [vmem:[%s1591_s4] ss:$0 sm:$0xff] }
  0x7f   :  { %996 = vmatpush3.bf16.msra.mxu0 %v995_v7 }
  0x80   :  { %997 = vmatprep.subr.bf16.mxu0 %v1357_v3 }
  0x83   :  { %999 = vmatpush3.bf16.msra.mxu0 %v998_v10 }
  0x84   :  { %1000 = vmatprep.subr.bf16.mxu0 %v1357_v3 }
  0x87   :  { %1002 = vmatpush3.bf16.msra.mxu0 %v1001_v13 }
  0x88   :  { %1003 = vmatprep.subr.bf16.mxu0 %v1357_v3 }
  0x8b   :  { %1005 = vmatpush3.bf16.msra.mxu0 %v1004_v16 }
  0x8c   :  { %1006 = vmatprep.subr.bf16.mxu0 %v1357_v3 }
  0x8f   :  { %1008 = vmatpush3.bf16.msra.mxu0 %v1007_v19 }
  0x90   :  { %1009 = vmatprep.subr.bf16.mxu0 %v1357_v3 }
  0x93   :  { %1011 = vmatpush3.bf16.msra.mxu0 %v1010_v22 }
  0x94   :  { %1012 = vmatprep.subr.bf16.mxu0 %v1357_v3 }
  0x97   :  { %1014 = vmatpush3.bf16.msra.mxu0 %v1013_v25 }
  0x9a   :  { %849 = vmatmul.mubr.f32.vlgmr.msra.gmra.mrb[0].mxu0 %v125_v26 }
 0x16d   :  { %v215_v28 = vpop.f32.mrb[0].mxu0 }
 0x16e   :  { %v216_v29 = vadd.f32 %v726_v27, %v215_v28  ;;  %v850_v30 = vpop.f32.mrb[1].mxu0 }
 0x170   :  { %v219_v31 = vmax.f32 %v216_v29, 0.0 }
 0x172   :  { %220 = vst [vmem:[#allocation2] sm:$0xff] %v219_v31  ;;  %221 = vst [vmem:[#allocation3] sm:$0xff] %v219_v31 }
 0x173 LB: > { %s229_s29 = smul.u32 3, %s1338_s14  ;;  %s246_s0 = scalar_lea.vmem [#allocation4], %s1338_s14  ;;  %s1338_s14 = sphi %s1336_s14, %s228_s14  }
 0x174   : > { %s228_s14 = sadd.s32 1, %s1338_s14  }
 0x175   : > { %s230_s11 = sld [smem:[#allocation5 + %s229_s29]]  ;;  %s233_s12 = sadd.s32 1, %s229_s29 }
 0x176   : > { %s234_s13 = sld [smem:[#allocation5 + %s233_s12]]  ;;  %s239_s15 = sadd.s32 2, %s229_s29 }
 0x177   : > { %s240_s16 = sld [smem:[#allocation5 + %s239_s15]]  ;;  %p225_p9 = scmp.ge.s32.totalorder %s228_s14, 8  }
 0x178   :  { %1015 = vmatprep.subr.bf16.mxu1 (%p225_p9), %v1357_v3  ;;  %v249_v40 = vld [vmem:[#allocation13] sm:$0xff] (%p225_p9)  ;;  %v250_v41 = vld [vmem:[#allocation13 + $0x8] sm:$0xff] (%p225_p9)  ;;  %v251_v42 = vld [vmem:[#allocation13 + $0x10] sm:$0xff] (%p225_p9)  ;;  %883 = vmatprep.mubr.msk.f32.mxu1 (%p225_p9), %vm1358_vm0, %v1359_v6  ;;  %s1340_s3 = smov (%p225_p9), 0  }
 0x179   :  { %v1016_v43 = vpack.c.bf16 (%p225_p9), %v250_v41, %v249_v40  ;;  %v252_v44 = vld [vmem:[#allocation13 + $0x18] sm:$0xff] (%p225_p9)  ;;  %v253_v46 = vld [vmem:[#allocation13 + $0x20] sm:$0xff] (%p225_p9)  ;;  %v254_v47 = vld [vmem:[#allocation13 + $0x28] sm:$0xff] (%p225_p9) }
 0x17a   :  { %v1019_v45 = vpack.c.bf16 (%p225_p9), %v252_v44, %v251_v42  ;;  %v1022_v48 = vpack.c.bf16 (%p225_p9), %v254_v47, %v253_v46  ;;  %v255_v49 = vld [vmem:[#allocation13 + $0x30] sm:$0xff] (%p225_p9)  ;;  %v256_v50 = vld [vmem:[#allocation13 + $0x38] sm:$0xff] (%p225_p9)  ;;  %v257_v52 = vld [vmem:[#allocation13 + $0x40] sm:$0xff] (%p225_p9) }
 0x17b   : > { %s231_s17 = scalar_lea.vmem [#allocation3], %s230_s11  ;;  %1017 = vmatpush3.bf16.msra.mxu1 (%p225_p9), %v1016_v43  ;;  %v1025_v51 = vpack.c.bf16 (%p225_p9), %v256_v50, %v255_v49  ;;  %v258_v53 = vld [vmem:[#allocation13 + $0x48] sm:$0xff] (%p225_p9)  ;;  %v259_v55 = vld [vmem:[#allocation13 + $0x50] sm:$0xff] (%p225_p9)  ;;  %v260_v56 = vld [vmem:[#allocation13 + $0x58] sm:$0xff] (%p225_p9) }
 0x17c   : > { %v232_v32 = vld [vmem:[%s231_s17] sm:$0x1]  ;;  %s235_s18 = scalar_lea.vmem [#allocation3], %s234_s13  ;;  %1018 = vmatprep.subr.bf16.mxu1 (%p225_p9), %v1357_v3  ;;  %v1028_v54 = vpack.c.bf16 (%p225_p9), %v258_v53, %v257_v52  ;;  %v1031_v57 = vpack.c.bf16 (%p225_p9), %v260_v56, %v259_v55  ;;  %v261_v58 = vld [vmem:[#allocation13 + $0x60] sm:$0xff] (%p225_p9)  ;;  %v262_v59 = vld [vmem:[#allocation13 + $0x68] sm:$0xff] (%p225_p9) }
 0x17d   : > { %v236_v33 = vld [vmem:[%s235_s18] sm:$0x1]  ;;  %s241_s4 = scalar_lea.vmem [#allocation3], %s240_s16  ;;  %v1034_v60 = vpack.c.bf16 (%p225_p9), %v262_v59, %v261_v58  ;;  %v264_v62 = vld [vmem:[#allocation13 + $0x78] sm:$0xff] (%p225_p9) }
 0x17e   : > { %v237_v34 = vadd.f32 %v236_v33, %v232_v32  ;;  %v238_v35 = vmax.f32 %v232_v32, %v236_v33  ;;  %v242_v36 = vld [vmem:[%s241_s4] sm:$0x1]  ;;  %227 = sbr.rel (!%p225_p9) target bundleno = 371 (0x173), region = 123  ;;  %v342_v4 = vld [vmem:[#allocation2] sm:$0xff] (%p225_p9) }
 0x17f   :  { %1020 = vmatpush3.bf16.msra.mxu1 (%p225_p9), %v1019_v45  ;;  %v263_v61 = vld [vmem:[#allocation13 + $0x70] sm:$0xff] (%p225_p9) }
 0x180   : > { %v243_v37 = vadd.f32 %v242_v36, %v237_v34  ;;  %v244_v38 = vmax.f32 %v238_v35, %v242_v36  ;;  %1021 = vmatprep.subr.bf16.mxu1 (%p225_p9), %v1357_v3  ;;  %v1037_v63 = vpack.c.bf16 (%p225_p9), %v264_v62, %v263_v61  ;;  %v727_v1 = vld [vmem:[%s1593_s6] ss:$0 sm:$0xff] (%p225_p9) }
 0x182   : > { %v245_v39 = vmul.f32 %v244_v38, %v243_v37 }
 0x183   :  { %1023 = vmatpush3.bf16.msra.mxu1 (%p225_p9), %v1022_v48 }
 0x184   : > { %247 = vst [vmem:[%s246_s0] sm:$0x1] %v245_v39  ;;  %1024 = vmatprep.subr.bf16.mxu1 (%p225_p9), %v1357_v3 }
 0x187   :  { %1026 = vmatpush3.bf16.msra.mxu1 %v1025_v51 }
 0x188   :  { %1027 = vmatprep.subr.bf16.mxu1 %v1357_v3 }
 0x18b   :  { %1029 = vmatpush3.bf16.msra.mxu1 %v1028_v54  ;;  %v248_v0 = vld [vmem:[#allocation4] sm:$0xff] }
 0x18c   :  { %1030 = vmatprep.subr.bf16.mxu1 %v1357_v3 }
 0x18f   :  { %1032 = vmatpush3.bf16.msra.mxu1 %v1031_v57 }
 0x190   :  { %1033 = vmatprep.subr.bf16.mxu1 %v1357_v3 }
 0x193   :  { %1035 = vmatpush3.bf16.msra.mxu1 %v1034_v60 }
 0x194   :  { %1036 = vmatprep.subr.bf16.mxu1 %v1357_v3 }
 0x197   :  { %1038 = vmatpush3.bf16.msra.mxu1 %v1037_v63 }
 0x19a   :  { %884 = vmatmul.mubr.f32.vlgmr.msra.gmra.mrb[0].mxu1 %v248_v0 }
 0x26d   :  { %v338_v2 = vpop.f32.mrb[0].mxu1 }
 0x26e   :  { %v339_v5 = vadd.f32 %v727_v1, %v338_v2  ;;  %v885_v7 = vpop.f32.mrb[1].mxu1 }
 0x270   :  { %v343_v8 = vadd.f32 %v342_v4, %v339_v5 }
 0x272   :  { %v344_v9 = vmax.f32 %v343_v8, 0.0 }
 0x274   :  { %345 = vst [vmem:[#allocation3] sm:$0xff] %v344_v9 }
 0x275 LB: > { %s352_s30 = smul.u32 3, %s1342_s3  ;;  %s369_s1 = scalar_lea.vmem [#allocation4], %s1342_s3  ;;  %s1342_s3 = sphi %s1340_s3, %s351_s3  }
 0x276   : > { %s351_s3 = sadd.s32 1, %s1342_s3  }
 0x277   : > { %s353_s21 = sld [smem:[#allocation5 + %s352_s30]]  ;;  %s356_s22 = sadd.s32 1, %s352_s30 }
 0x278   : > { %s357_s23 = sld [smem:[#allocation5 + %s356_s22]]  ;;  %s362_s24 = sadd.s32 2, %s352_s30 }
 0x279   : > { %s363_s25 = sld [smem:[#allocation5 + %s362_s24]]  ;;  %p348_p10 = scmp.ge.s32.totalorder %s351_s3, 8  }
 0x27a   :  { %1039 = vmatprep.subr.bf16.mxu0 (%p348_p10), %v1357_v3  ;;  %v373_v18 = vld [vmem:[#allocation13 + $0x80] sm:$0xff] (%p348_p10)  ;;  %v374_v19 = vld [vmem:[#allocation13 + $0x88] sm:$0xff] (%p348_p10)  ;;  %v375_v20 = vld [vmem:[#allocation13 + $0x90] sm:$0xff] (%p348_p10)  ;;  %918 = vmatprep.mubr.msk.f32.mxu0 (%p348_p10), %vm1358_vm0, %v1359_v6  ;;  %s1344_s8 = smov (%p348_p10), 0  }
 0x27b   :  { %v1040_v21 = vpack.c.bf16 (%p348_p10), %v374_v19, %v373_v18  ;;  %v376_v22 = vld [vmem:[#allocation13 + $0x98] sm:$0xff] (%p348_p10)  ;;  %v377_v24 = vld [vmem:[#allocation13 + $0xa0] sm:$0xff] (%p348_p10)  ;;  %v378_v25 = vld [vmem:[#allocation13 + $0xa8] sm:$0xff] (%p348_p10) }
 0x27c   :  { %v1043_v23 = vpack.c.bf16 (%p348_p10), %v376_v22, %v375_v20  ;;  %v1046_v26 = vpack.c.bf16 (%p348_p10), %v378_v25, %v377_v24  ;;  %v379_v27 = vld [vmem:[#allocation13 + $0xb0] sm:$0xff] (%p348_p10)  ;;  %v380_v28 = vld [vmem:[#allocation13 + $0xb8] sm:$0xff] (%p348_p10)  ;;  %v381_v30 = vld [vmem:[#allocation13 + $0xc0] sm:$0xff] (%p348_p10) }
 0x27d   : > { %s354_s27 = scalar_lea.vmem [#allocation3], %s353_s21  ;;  %1041 = vmatpush3.bf16.msra.mxu0 (%p348_p10), %v1040_v21  ;;  %v1049_v29 = vpack.c.bf16 (%p348_p10), %v380_v28, %v379_v27  ;;  %v382_v31 = vld [vmem:[#allocation13 + $0xc8] sm:$0xff] (%p348_p10)  ;;  %v383_v33 = vld [vmem:[#allocation13 + $0xd0] sm:$0xff] (%p348_p10)  ;;  %v384_v34 = vld [vmem:[#allocation13 + $0xd8] sm:$0xff] (%p348_p10) }
 0x27e   : > { %v355_v10 = vld [vmem:[%s354_s27] sm:$0x1]  ;;  %s358_s28 = scalar_lea.vmem [#allocation3], %s357_s23  ;;  %1042 = vmatprep.subr.bf16.mxu0 (%p348_p10), %v1357_v3  ;;  %v1052_v32 = vpack.c.bf16 (%p348_p10), %v382_v31, %v381_v30  ;;  %v1055_v35 = vpack.c.bf16 (%p348_p10), %v384_v34, %v383_v33  ;;  %v385_v36 = vld [vmem:[#allocation13 + $0xe0] sm:$0xff] (%p348_p10)  ;;  %v386_v37 = vld [vmem:[#allocation13 + $0xe8] sm:$0xff] (%p348_p10) }
 0x27f   : > { %v359_v11 = vld [vmem:[%s358_s28] sm:$0x1]  ;;  %s364_s5 = scalar_lea.vmem [#allocation3], %s363_s25  ;;  %v1058_v38 = vpack.c.bf16 (%p348_p10), %v386_v37, %v385_v36  ;;  %v388_v40 = vld [vmem:[#allocation13 + $0xf8] sm:$0xff] (%p348_p10)  ;;  %v729_v43 = vld [vmem:[%s1593_s6 + $0x1] ss:$0 sm:$0xff] (%p348_p10) }
 0x280   : > { %v360_v12 = vadd.f32 %v359_v11, %v355_v10  ;;  %v361_v13 = vmax.f32 %v355_v10, %v359_v11  ;;  %v365_v14 = vld [vmem:[%s364_s5] sm:$0x1]  ;;  %350 = sbr.rel (!%p348_p10) target bundleno = 629 (0x275), region = 134  ;;  %v467_v45 = vld [vmem:[#allocation2] sm:$0xff] (%p348_p10) }
 0x281   :  { %1044 = vmatpush3.bf16.msra.mxu0 (%p348_p10), %v1043_v23  ;;  %v387_v39 = vld [vmem:[#allocation13 + $0xf0] sm:$0xff] (%p348_p10) }
 0x282   : > { %v366_v15 = vadd.f32 %v365_v14, %v360_v12  ;;  %v367_v16 = vmax.f32 %v361_v13, %v365_v14  ;;  %1045 = vmatprep.subr.bf16.mxu0 (%p348_p10), %v1357_v3  ;;  %v1061_v41 = vpack.c.bf16 (%p348_p10), %v388_v40, %v387_v39 }
 0x284   : > { %v368_v17 = vmul.f32 %v367_v16, %v366_v15 }
 0x285   :  { %1047 = vmatpush3.bf16.msra.mxu0 (%p348_p10), %v1046_v26 }
 0x286   : > { %370 = vst [vmem:[%s369_s1] sm:$0x1] %v368_v17  ;;  %1048 = vmatprep.subr.bf16.mxu0 (%p348_p10), %v1357_v3 }
 0x289   :  { %1050 = vmatpush3.bf16.msra.mxu0 %v1049_v29 }
 0x28a   :  { %1051 = vmatprep.subr.bf16.mxu0 %v1357_v3 }
 0x28d   :  { %1053 = vmatpush3.bf16.msra.mxu0 %v1052_v32  ;;  %v371_v42 = vld [vmem:[#allocation4] sm:$0xff] }
 0x28e   :  { %1054 = vmatprep.subr.bf16.mxu0 %v1357_v3 }
 0x291   :  { %1056 = vmatpush3.bf16.msra.mxu0 %v1055_v35 }
 0x292   :  { %1057 = vmatprep.subr.bf16.mxu0 %v1357_v3 }
 0x295   :  { %1059 = vmatpush3.bf16.msra.mxu0 %v1058_v38 }
 0x296   :  { %1060 = vmatprep.subr.bf16.mxu0 %v1357_v3 }
 0x299   :  { %1062 = vmatpush3.bf16.msra.mxu0 %v1061_v41 }
 0x29c   :  { %919 = vmatmul.mubr.f32.vlgmr.msra.gmra.mrb[2].mxu0 %v371_v42 }
 0x36f   :  { %v463_v44 = vpop.f32.mrb[2].mxu0 }
 0x370   :  { %v464_v46 = vadd.f32 %v729_v43, %v463_v44  ;;  %v920_v47 = vpop.f32.mrb[3].mxu0 }
 0x372   :  { %v468_v48 = vadd.f32 %v467_v45, %v464_v46 }
 0x374   :  { %v469_v49 = vmax.f32 %v468_v48, 0.0 }
 0x376   :  { %470 = vst [vmem:[#allocation3] sm:$0xff] %v469_v49 }
 0x377 LB: > { %s477_s2 = smul.u32 3, %s1346_s8  ;;  %s494_s17 = scalar_lea.vmem [#allocation4], %s1346_s8  ;;  %s1346_s8 = sphi %s1344_s8, %s476_s8  }
 0x378   : > { %s476_s8 = sadd.s32 1, %s1346_s8  }
 0x379   : > { %s478_s14 = sld [smem:[#allocation5 + %s477_s2]]  ;;  %s481_s29 = sadd.s32 1, %s477_s2 }
 0x37a   : > { %s482_s11 = sld [smem:[#allocation5 + %s481_s29]]  ;;  %s487_s12 = sadd.s32 2, %s477_s2 }
 0x37b   : > { %s488_s13 = sld [smem:[#allocation5 + %s487_s12]]  ;;  %p473_p11 = scmp.ge.s32.totalorder %s476_s8, 8  }
 0x37c   :  { %1063 = vmatprep.subr.bf16.mxu1 (%p473_p11), %v1357_v3  ;;  %1087 = vmatprep.subr.bf16.mxu0 (%p473_p11), %v1357_v3  ;;  %v514_v58 = vld [vmem:[#allocation16] sm:$0xff] (%p473_p11)  ;;  %v515_v59 = vld [vmem:[#allocation16 + $0x8] sm:$0xff] (%p473_p11)  ;;  %v516_v63 = vld [vmem:[#allocation16 + $0x10] sm:$0xff] (%p473_p11)  ;;  %s1360_s0 = smov (%p473_p11), [#allocation18]  }
 0x37d   :  { %v497_v60 = vld [vmem:[#allocation15] sm:$0xff] (%p473_p11)  ;;  %v1064_v61 = vpack.c.bf16 (%p473_p11), %v515_v59, %v514_v58  ;;  %v498_v62 = vld [vmem:[#allocation15 + $0x8] sm:$0xff] (%p473_p11)  ;;  %v517_v0 = vld [vmem:[#allocation16 + $0x18] sm:$0xff] (%p473_p11)  ;;  %953 = vmatprep.mubr.msk.f32.mxu1 (%p473_p11), %vm1358_vm0, %v1359_v6  ;;  %988 = vmatprep.mubr.msk.f32.mxu0 (%p473_p11), %vm1358_vm0, %v1359_v6  ;;  %s686_s19 = sshll.u32 (%p473_p11), %s1360_s0, 4  ;;  %s687_s19 = int_to_ptr.vmem [resolvable:$true] %s686_s19 }
 0x37e   :  { %v1088_v1 = vpack.c.bf16 (%p473_p11), %v498_v62, %v497_v60  ;;  %v499_v2 = vld [vmem:[#allocation15 + $0x10] sm:$0xff] (%p473_p11)  ;;  %v500_v4 = vld [vmem:[#allocation15 + $0x18] sm:$0xff] (%p473_p11)  ;;  %v1067_v5 = vpack.c.bf16 (%p473_p11), %v517_v0, %v516_v63  ;;  %v518_v8 = vld [vmem:[#allocation16 + $0x20] sm:$0xff] (%p473_p11)  ;;  %s1290_s20 = scalar_lea.vmem (%p473_p11), %s687_s19, 128  ;;  %p1295_p13 = scmp.lt.s32.totalorder (%p473_p11), %s687_s19, %s687_s19 }
 0x37f   : > { %s479_s15 = scalar_lea.vmem [#allocation3], %s478_s14  ;;  %1065 = vmatpush3.bf16.msra.mxu1 (%p473_p11), %v1064_v61  ;;  %v1091_v7 = vpack.c.bf16 (%p473_p11), %v500_v4, %v499_v2  ;;  %v519_v9 = vld [vmem:[#allocation16 + $0x28] sm:$0xff] (%p473_p11)  ;;  %v501_v10 = vld [vmem:[#allocation15 + $0x20] sm:$0xff] (%p473_p11)  ;;  %v520_v13 = vld [vmem:[#allocation16 + $0x30] sm:$0xff] (%p473_p11)  ;;  %p1291_p12 = scmp.ne.s32.totalorder (%p473_p11), %s687_s19, %s1290_s20 }
 0x380   : > { %v480_v50 = vld [vmem:[%s479_s15] sm:$0x1]  ;;  %s483_s6 = scalar_lea.vmem [#allocation3], %s482_s11  ;;  %1089 = vmatpush3.bf16.msra.mxu0 (%p473_p11), %v1088_v1  ;;  %1066 = vmatprep.subr.bf16.mxu1 (%p473_p11), %v1357_v3  ;;  %v502_v11 = vld [vmem:[#allocation15 + $0x28] sm:$0xff] (%p473_p11)  ;;  %v1070_v12 = vpack.c.bf16 (%p473_p11), %v519_v9, %v518_v8  ;;  %v521_v14 = vld [vmem:[#allocation16 + $0x38] sm:$0xff] (%p473_p11)  ;;  %p1296_p0 = scmp.lt.s32.totalorder (%p473_p11), %s1290_s20, %s1290_s20 }
 0x381   : > { %v484_v51 = vld [vmem:[%s483_s6] sm:$0x1]  ;;  %s489_s16 = scalar_lea.vmem [#allocation3], %s488_s13  ;;  %1090 = vmatprep.subr.bf16.mxu0 (%p473_p11), %v1357_v3  ;;  %v1094_v6 = vpack.c.bf16 (%p473_p11), %v502_v11, %v501_v10  ;;  %v504_v16 = vld [vmem:[#allocation15 + $0x38] sm:$0xff] (%p473_p11)  ;;  %v1073_v17 = vpack.c.bf16 (%p473_p11), %v521_v14, %v520_v13  ;;  %v522_v19 = vld [vmem:[#allocation16 + $0x40] sm:$0xff] (%p473_p11) }
 0x382   : > { %v485_v52 = vadd.f32 %v484_v51, %v480_v50  ;;  %v486_v53 = vmax.f32 %v480_v50, %v484_v51  ;;  %v490_v54 = vld [vmem:[%s489_s16] sm:$0x1]  ;;  %475 = sbr.rel (!%p473_p11) target bundleno = 887 (0x377), region = 145  ;;  %v523_v20 = vld [vmem:[#allocation16 + $0x48] sm:$0xff] (%p473_p11)  ;;  %v505_v21 = vld [vmem:[#allocation15 + $0x40] sm:$0xff] (%p473_p11)  ;;  %p1297_p1 = por (%p473_p11), %p1296_p0, %p1295_p13 }
 0x383   :  { %1068 = vmatpush3.bf16.msra.mxu1 (%p473_p11), %v1067_v5  ;;  %v503_v15 = vld [vmem:[#allocation15 + $0x30] sm:$0xff] (%p473_p11)  ;;  %v506_v22 = vld [vmem:[#allocation15 + $0x48] sm:$0xff] (%p473_p11)  ;;  %v1076_v23 = vpack.c.bf16 (%p473_p11), %v523_v20, %v522_v19  ;;  %v525_v26 = vld [vmem:[#allocation16 + $0x58] sm:$0xff] (%p473_p11) }
 0x384   : > { %v491_v55 = vadd.f32 %v490_v54, %v485_v52  ;;  %v492_v56 = vmax.f32 %v486_v53, %v490_v54  ;;  %1092 = vmatpush3.bf16.msra.mxu0 (%p473_p11), %v1091_v7  ;;  %1069 = vmatprep.subr.bf16.mxu1 (%p473_p11), %v1357_v3  ;;  %v1097_v18 = vpack.c.bf16 (%p473_p11), %v504_v16, %v503_v15  ;;  %v524_v25 = vld [vmem:[#allocation16 + $0x50] sm:$0xff] (%p473_p11)  ;;  %v508_v28 = vld [vmem:[#allocation15 + $0x58] sm:$0xff] (%p473_p11)  ;;  %v526_v31 = vld [vmem:[#allocation16 + $0x60] sm:$0xff] (%p473_p11)  ;;  %p1298_p2 = pnand (%p473_p11), %p1297_p1, %p1291_p12 }
 0x385   :  { %1093 = vmatprep.subr.bf16.mxu0 (%p473_p11), %v1357_v3  ;;  %v1100_v24 = vpack.c.bf16 (%p473_p11), %v506_v22, %v505_v21  ;;  %v507_v27 = vld [vmem:[#allocation15 + $0x50] sm:$0xff] (%p473_p11)  ;;  %v1079_v29 = vpack.c.bf16 (%p473_p11), %v525_v26, %v524_v25  ;;  %v527_v32 = vld [vmem:[#allocation16 + $0x68] sm:$0xff] (%p473_p11)  ;;  %v509_v33 = vld [vmem:[#allocation15 + $0x60] sm:$0xff] (%p473_p11) }
 0x386   : > { %v493_v57 = vmul.f32 %v492_v56, %v491_v55  ;;  %v1103_v30 = vpack.c.bf16 (%p473_p11), %v508_v28, %v507_v27  ;;  %v510_v34 = vld [vmem:[#allocation15 + $0x68] sm:$0xff] (%p473_p11)  ;;  %v1082_v35 = vpack.c.bf16 (%p473_p11), %v527_v32, %v526_v31  ;;  %v528_v37 = vld [vmem:[#allocation16 + $0x70] sm:$0xff] (%p473_p11)  ;;  %v529_v38 = vld [vmem:[#allocation16 + $0x78] sm:$0xff] (%p473_p11) }
 0x387   :  { %1071 = vmatpush3.bf16.msra.mxu1 (%p473_p11), %v1070_v12  ;;  %v1106_v36 = vpack.c.bf16 (%p473_p11), %v510_v34, %v509_v33  ;;  %v511_v39 = vld [vmem:[#allocation15 + $0x70] sm:$0xff] (%p473_p11)  ;;  %v512_v40 = vld [vmem:[#allocation15 + $0x78] sm:$0xff] (%p473_p11)  ;;  %v1085_v41 = vpack.c.bf16 (%p473_p11), %v529_v38, %v528_v37 }
 0x388   : > { %495 = vst [vmem:[%s494_s17] sm:$0x1] %v493_v57  ;;  %1095 = vmatpush3.bf16.msra.mxu0 (%p473_p11), %v1094_v6  ;;  %1072 = vmatprep.subr.bf16.mxu1 (%p473_p11), %v1357_v3  ;;  %v1109_v42 = vpack.c.bf16 (%p473_p11), %v512_v40, %v511_v39  ;;  %v496_v44 = vld [vmem:[#allocation10] sm:$0xff] (%p473_p11)  ;;  %v730_v48 = vld [vmem:[%s1596_s9] ss:$0 sm:$0xff] (%p473_p11) }
 0x389   :  { %1096 = vmatprep.subr.bf16.mxu0 %v1357_v3 }
 0x38b   :  { %1074 = vmatpush3.bf16.msra.mxu1 %v1073_v17 }
 0x38c   :  { %1098 = vmatpush3.bf16.msra.mxu0 %v1097_v18  ;;  %1075 = vmatprep.subr.bf16.mxu1 %v1357_v3 }
 0x38d   :  { %1099 = vmatprep.subr.bf16.mxu0 %v1357_v3 }
 0x38f   :  { %1077 = vmatpush3.bf16.msra.mxu1 %v1076_v23  ;;  %v513_v43 = vld [vmem:[#allocation4] sm:$0xff] }
 0x390   :  { %1101 = vmatpush3.bf16.msra.mxu0 %v1100_v24  ;;  %1078 = vmatprep.subr.bf16.mxu1 %v1357_v3 }
 0x391   :  { %1102 = vmatprep.subr.bf16.mxu0 %v1357_v3 }
 0x393   :  { %1080 = vmatpush3.bf16.msra.mxu1 %v1079_v29 }
 0x394   :  { %1104 = vmatpush3.bf16.msra.mxu0 %v1103_v30  ;;  %1081 = vmatprep.subr.bf16.mxu1 %v1357_v3 }
 0x395   :  { %1105 = vmatprep.subr.bf16.mxu0 %v1357_v3 }
 0x397   :  { %1083 = vmatpush3.bf16.msra.mxu1 %v1082_v35 }
 0x398   :  { %1107 = vmatpush3.bf16.msra.mxu0 %v1106_v36  ;;  %1084 = vmatprep.subr.bf16.mxu1 %v1357_v3 }
 0x399   :  { %1108 = vmatprep.subr.bf16.mxu0 %v1357_v3 }
 0x39b   :  { %1086 = vmatpush3.bf16.msra.mxu1 %v1085_v41 }
 0x39c   :  { %1110 = vmatpush3.bf16.msra.mxu0 %v1109_v42 }
 0x39e   :  { %954 = vmatmul.mubr.f32.vlgmr.msra.gmra.mrb[2].mxu1 %v513_v43 }
 0x39f   :  { %989 = vmatmul.mubr.f32.vlgmr.msra.gmra.mrb[4].mxu0 %v496_v44 }
 0x471   :  { %v596_v45 = vpop.f32.mrb[2].mxu1 }
 0x472   :  { %v666_v46 = vpop.f32.mrb[4].mxu0  ;;  %v955_v47 = vpop.f32.mrb[3].mxu1 }
 0x473   :  { %v667_v49 = vadd.f32 %v666_v46, %v596_v45  ;;  %v990_v50 = vpop.f32.mrb[5].mxu0 }
 0x475   :  { %v677_v51 = vadd.f32 %v730_v48, %v667_v49 }
 0x477   :  { %v678_v52 = vmax.f32 %v677_v51, 0.0 }
 0x479   :  { %679 = vst [vmem:[#allocation18] sm:$0xff] %v678_v52 }
 0x47a   :  { %1301 = shalt.err (!%p1298_p2)
}
 0x47b   :  { %s1302_s21 = scalar_lea.hbm %s1597_s10, 128 }
 0x47c   :  { %p1303_p3 = scmp.ne.s32.totalorder %s1597_s10, %s1302_s21  ;;  %p1306_p4 = scmp.lt.u32.totalorder %s1302_s21, %s1597_s10 }
 0x47e   :  { %p1308_p5 = pnand %p1306_p4, %p1303_p3 }
 0x480   :  { %1311 = shalt.err (!%p1308_p5)
}
 0x481   :  { %689 = dma.vmem_to_hbm [thread:$0]  %s687_s19, 128, %s1597_s10, [#allocation7]  }
 0x482   :  { %1334 = dma.done.wait [#allocation7], 128  }
 0x483   :  { %1335 = vsyncadd [#allocation7], 4294967168 }
 0x484   :  { %693 = vsyncpa [#allocation6], 1 }
 0x485   :  { %694 = vsyncpa [#allocation11], 1 }
 0x486   :  { %695 = vsyncpa [#allocation14], 1 }
 0x487   :  { %696 = vsyncpa [#allocation17], 1 }
 0x488   :  { %697 = vsyncpa [#allocation7], 1 }
 0x489   :  { %698 = vsyncpa [#allocation8], 1 }

</bundles_post_ra>
